<compile_context>
chip_gen: v7x
topology: tpu7x:2x2x1
jax: 0.10.0
libtpu: 0.0.40
codegen_flags: <defaults>
</compile_context>

<pallas_src>
from functools import partial

import numpy as np
import jax
import jax.numpy as jnp
from jax.experimental import pallas as pl
from jax.experimental.pallas import tpu as pltpu


def _fused_attention_kernel(x_ref, wblk_ref, bt_ref, attt_ref, z_ref, *,
                            n_paths, rows_per_path, n_nodes, n_pad_rows,
                            copies_per_row):
    # x_ref    : (n_paths*rows_per_path, 128)  lane-dense packed embeddings
    # wblk_ref : (128, 128)  block-diagonal fc weight (128//hidden copies of W^T)
    # bt_ref   : (1, 128)    fc bias, tiled across the 128 lanes
    # attt_ref : (1, 128)    semantic attention vector, tiled across lanes
    # z_ref    : (rows_per_path, 128)  lane-dense combined output
    L = rows_per_path
    x = x_ref[...]                                            # single VMEM copy
    bt = bt_ref[...]
    attt = attt_ref[...]

    # ---- phase 1: fc + tanh for ALL metapaths in one MXU matmul -------------
    h = jnp.tanh(
        jnp.dot(x, wblk_ref[...], preferred_element_type=jnp.float32) + bt
    )                                                         # (P*L, 128)
    wgt = h * attt                                            # (P*L, 128)

    # ---- phase 2: per-metapath scores + in-kernel softmax -------------------
    raw = []
    for p in range(n_paths):                                  # static unroll, P small
        wp = wgt[p * L:(p + 1) * L, :]
        raw.append(jnp.sum(wp, axis=(0, 1), keepdims=True))   # XLU reduce (1,1)

    if n_pad_rows:
        # Each zero-padded node row contributes sum(tanh(b) * att).  bt/attt are
        # tiled `copies_per_row` times, so sum over all 128 lanes = R * c0.
        c_all = jnp.sum(jnp.tanh(bt) * attt, axis=1, keepdims=True)   # (1,1)
        c0 = c_all * (1.0 / float(copies_per_row))
        raw = [r - float(n_pad_rows) * c0 for r in raw]

    inv_n = 1.0 / float(n_nodes)
    scores = [r * inv_n for r in raw]                         # (1,1) each

    m = scores[0]
    for p in range(1, n_paths):
        m = jnp.maximum(m, scores[p])
    e = [jnp.exp(s - m) for s in scores]                      # EUP
    den = e[0]
    for p in range(1, n_paths):
        den = den + e[p]
    inv_den = 1.0 / den                                       # exact (tiny, 1 value)

    # ---- phase 3: beta-weighted combine, 128-lane-dense stores --------------
    z = (e[0] * inv_den) * x[0:L, :]
    for p in range(1, n_paths):
        z = z + (e[p] * inv_den) * x[p * L:(p + 1) * L, :]
    z_ref[...] = z


@jax.jit
def attention_forward(embeds, w, b, att):
    """embeds: (P, N, D) f32; w: (D, D) torch-layout (out,in); b: (D,); att: (1, D)."""
    P, N, D = embeds.shape
    assert 128 % D == 0, "hidden_dim must divide 128 for the lane-dense packing"
    R = 128 // D                               # node rows packed per 128-lane row
    N_pad = ((N + R - 1) // R) * R
    n_pad = N_pad - N
    if n_pad:
        embeds_p = jnp.pad(embeds, ((0, 0), (0, n_pad), (0, 0)))
    else:
        embeds_p = embeds
    L = (N_pad * D) // 128

    # Layout plumbing in the wrapper (contiguous reshapes — free):
    x_ld = embeds_p.reshape(P * L, 128)                      # lane-dense embeds
    wblk = jnp.kron(jnp.eye(R, dtype=w.dtype), w.T)          # (128,128) block-diag W^T
    bt = jnp.tile(b, R).reshape(1, 128)                      # bias tiled
    attt = jnp.tile(att.reshape(1, D), (1, R))               # att tiled

    kernel = partial(_fused_attention_kernel,
                     n_paths=P, rows_per_path=L, n_nodes=N,
                     n_pad_rows=n_pad, copies_per_row=R)

    z_ld = pl.pallas_call(
        kernel,
        out_shape=jax.ShapeDtypeStruct((L, 128), jnp.float32),
        grid_spec=pltpu.PrefetchScalarGridSpec(
            num_scalar_prefetch=0,
            grid=(1,),                                       # whole problem in VMEM
            in_specs=[
                pl.BlockSpec((P * L, 128), lambda i: (0, 0)),
                pl.BlockSpec((128, 128), lambda i: (0, 0)),
                pl.BlockSpec((1, 128), lambda i: (0, 0)),
                pl.BlockSpec((1, 128), lambda i: (0, 0)),
            ],
            out_specs=pl.BlockSpec((L, 128), lambda i: (0, 0)),
        ),
        compiler_params=pltpu.CompilerParams(
            dimension_semantics=("arbitrary",)),
    )(x_ld, wblk, bt, attt)

    # Unpack the lane-dense output back to (N, D) — free reshape + slice.
    z = z_ld.reshape(N_pad, D)[:N]
    return z


if __name__ == "__main__":
    P, N, D = 3, 16, 32  # 3 metapaths, 16 nodes, hidden_dim=32
    key = jax.random.PRNGKey(0)
    k1, k2, k3, k4 = jax.random.split(key, 4)

    embeds = jax.random.normal(k1, (P, N, D), jnp.float32)

    # Deterministic parameter init mirroring the module's __init__:
    gain = 1.414
    w_std = gain * np.sqrt(2.0 / (D + D))         # xavier_normal_ for fc.weight (D, D)
    att_std = gain * np.sqrt(2.0 / (1 + D))       # xavier_normal_ for att (1, D)
    b_bound = 1.0 / np.sqrt(D)                    # default nn.Linear bias init
    w = w_std * jax.random.normal(k2, (D, D), jnp.float32)
    b = jax.random.uniform(k3, (D,), jnp.float32, -b_bound, b_bound)
    att = att_std * jax.random.normal(k4, (1, D), jnp.float32)

    z = attention_forward(embeds, w, b, att)
    z = jax.block_until_ready(z)

    # Pure-JAX reference of the PyTorch forward pass.
    h_ref = jnp.tanh(embeds @ w.T + b)            # (P, N, D)
    sp_ref = h_ref.mean(axis=1)                   # (P, D)
    scores_ref = sp_ref @ att[0]                  # (P,)
    beta_ref = jax.nn.softmax(scores_ref)
    z_ref = jnp.einsum("p,pnd->nd", beta_ref, embeds)

    np.testing.assert_allclose(np.asarray(z), np.asarray(z_ref),
                               rtol=2e-5, atol=2e-5)

    print("KERNEL_OK")
</pallas_src>

<mosaic_0001>
module attributes {stable_mosaic.version = 11 : i64} {
  func.func @_fused_attention_kernel(%arg0: i32, %arg1: memref<12x128xf32, #tpu.memory_space<vmem>>, %arg2: memref<128x128xf32, #tpu.memory_space<vmem>>, %arg3: memref<1x128xf32, #tpu.memory_space<vmem>>, %arg4: memref<1x128xf32, #tpu.memory_space<vmem>>, %arg5: memref<4x128xf32, #tpu.memory_space<vmem>>) attributes {dimension_semantics = [#tpu.dimension_semantics<arbitrary>], iteration_bounds = array<i64: 1>, scalar_prefetch = 0 : i64, scratch_operands = 0 : i64, tpu.core_type = #tpu.core_type<tc>, window_params = [{pipeline_mode = #tpu.pipeline_mode<synchronous>, transform_indices = @transform_0, window_bounds = array<i64: 12, 128>}, {pipeline_mode = #tpu.pipeline_mode<synchronous>, transform_indices = @transform_1, window_bounds = array<i64: 128, 128>}, {pipeline_mode = #tpu.pipeline_mode<synchronous>, transform_indices = @transform_2, window_bounds = array<i64: 1, 128>}, {pipeline_mode = #tpu.pipeline_mode<synchronous>, transform_indices = @transform_3, window_bounds = array<i64: 1, 128>}, {pipeline_mode = #tpu.pipeline_mode<synchronous>, transform_indices = @transform_4, window_bounds = array<i64: 4, 128>}]} {
    %c0 = arith.constant 0 : index
    %c0_0 = arith.constant 0 : index
    %0 = vector.load %arg1[%c0, %c0_0] : memref<12x128xf32, #tpu.memory_space<vmem>>, vector<12x128xf32>
    %c0_1 = arith.constant 0 : index
    %c0_2 = arith.constant 0 : index
    %1 = vector.load %arg3[%c0_1, %c0_2] : memref<1x128xf32, #tpu.memory_space<vmem>>, vector<1x128xf32>
    %c0_3 = arith.constant 0 : index
    %c0_4 = arith.constant 0 : index
    %2 = vector.load %arg4[%c0_3, %c0_4] : memref<1x128xf32, #tpu.memory_space<vmem>>, vector<1x128xf32>
    %c0_5 = arith.constant 0 : index
    %c0_6 = arith.constant 0 : index
    %3 = vector.load %arg2[%c0_5, %c0_6] : memref<128x128xf32, #tpu.memory_space<vmem>>, vector<128x128xf32>
    %cst = arith.constant dense<0.000000e+00> : vector<12x128xf32>
    %4 = tpu.matmul %0, %3, %cst {dimension_numbers = #tpu.dot_dimension_numbers<[1], [0], [0], [1], [0, 0, 1, 1], [], []>} : vector<12x128xf32>, vector<128x128xf32>, vector<12x128xf32> -> vector<12x128xf32>
    %5 = vector.broadcast %1 : vector<1x128xf32> to vector<12x128xf32>
    %6 = arith.addf %4, %5 : vector<12x128xf32>
    %7 = math.tanh %6 : vector<12x128xf32>
    %8 = vector.broadcast %2 : vector<1x128xf32> to vector<12x128xf32>
    %9 = arith.mulf %7, %8 : vector<12x128xf32>
    %10 = vector.extract_strided_slice %9 {offsets = [0, 0], sizes = [4, 128], strides = [1, 1]} : vector<12x128xf32> to vector<4x128xf32>
    %11 = vector.shape_cast %10 : vector<4x128xf32> to vector<1x4x128xf32>
    %cst_7 = arith.constant dense<0.000000e+00> : vector<1xf32>
    %12 = vector.multi_reduction <add>, %11, %cst_7 [1, 2] : vector<1x4x128xf32> to vector<1xf32>
    %13 = vector.shape_cast %12 : vector<1xf32> to vector<1x1x1xf32>
    %14 = vector.extract %13[0, 0, 0] : f32 from vector<1x1x1xf32>
    %15 = vector.broadcast %14 : f32 to vector<1x1xf32>
    %16 = vector.extract_strided_slice %9 {offsets = [4, 0], sizes = [4, 128], strides = [1, 1]} : vector<12x128xf32> to vector<4x128xf32>
    %17 = vector.shape_cast %16 : vector<4x128xf32> to vector<1x4x128xf32>
    %cst_8 = arith.constant dense<0.000000e+00> : vector<1xf32>
    %18 = vector.multi_reduction <add>, %17, %cst_8 [1, 2] : vector<1x4x128xf32> to vector<1xf32>
    %19 = vector.shape_cast %18 : vector<1xf32> to vector<1x1x1xf32>
    %20 = vector.extract %19[0, 0, 0] : f32 from vector<1x1x1xf32>
    %21 = vector.broadcast %20 : f32 to vector<1x1xf32>
    %22 = vector.extract_strided_slice %9 {offsets = [8, 0], sizes = [4, 128], strides = [1, 1]} : vector<12x128xf32> to vector<4x128xf32>
    %23 = vector.shape_cast %22 : vector<4x128xf32> to vector<1x4x128xf32>
    %cst_9 = arith.constant dense<0.000000e+00> : vector<1xf32>
    %24 = vector.multi_reduction <add>, %23, %cst_9 [1, 2] : vector<1x4x128xf32> to vector<1xf32>
    %25 = vector.shape_cast %24 : vector<1xf32> to vector<1x1x1xf32>
    %26 = vector.extract %25[0, 0, 0] : f32 from vector<1x1x1xf32>
    %27 = vector.broadcast %26 : f32 to vector<1x1xf32>
    %cst_10 = arith.constant 6.250000e-02 : f32
    %28 = vector.broadcast %cst_10 : f32 to vector<1x1xf32>
    %29 = arith.mulf %15, %28 : vector<1x1xf32>
    %cst_11 = arith.constant 6.250000e-02 : f32
    %30 = vector.broadcast %cst_11 : f32 to vector<1x1xf32>
    %31 = arith.mulf %21, %30 : vector<1x1xf32>
    %cst_12 = arith.constant 6.250000e-02 : f32
    %32 = vector.broadcast %cst_12 : f32 to vector<1x1xf32>
    %33 = arith.mulf %27, %32 : vector<1x1xf32>
    %34 = arith.maximumf %29, %31 : vector<1x1xf32>
    %35 = arith.maximumf %34, %33 : vector<1x1xf32>
    %36 = arith.subf %29, %35 : vector<1x1xf32>
    %37 = math.exp %36 : vector<1x1xf32>
    %38 = arith.subf %31, %35 : vector<1x1xf32>
    %39 = math.exp %38 : vector<1x1xf32>
    %40 = arith.subf %33, %35 : vector<1x1xf32>
    %41 = math.exp %40 : vector<1x1xf32>
    %42 = arith.addf %37, %39 : vector<1x1xf32>
    %43 = arith.addf %42, %41 : vector<1x1xf32>
    %cst_13 = arith.constant 1.000000e+00 : f32
    %44 = vector.broadcast %cst_13 : f32 to vector<1x1xf32>
    %45 = arith.divf %44, %43 : vector<1x1xf32>
    %46 = arith.mulf %37, %45 : vector<1x1xf32>
    %47 = vector.extract_strided_slice %0 {offsets = [0, 0], sizes = [4, 128], strides = [1, 1]} : vector<12x128xf32> to vector<4x128xf32>
    %48 = vector.broadcast %46 : vector<1x1xf32> to vector<4x128xf32>
    %49 = arith.mulf %48, %47 : vector<4x128xf32>
    %50 = arith.mulf %39, %45 : vector<1x1xf32>
    %51 = vector.extract_strided_slice %0 {offsets = [4, 0], sizes = [4, 128], strides = [1, 1]} : vector<12x128xf32> to vector<4x128xf32>
    %52 = vector.broadcast %50 : vector<1x1xf32> to vector<4x128xf32>
    %53 = arith.mulf %52, %51 : vector<4x128xf32>
    %54 = arith.addf %49, %53 : vector<4x128xf32>
    %55 = arith.mulf %41, %45 : vector<1x1xf32>
    %56 = vector.extract_strided_slice %0 {offsets = [8, 0], sizes = [4, 128], strides = [1, 1]} : vector<12x128xf32> to vector<4x128xf32>
    %57 = vector.broadcast %55 : vector<1x1xf32> to vector<4x128xf32>
    %58 = arith.mulf %57, %56 : vector<4x128xf32>
    %59 = arith.addf %54, %58 : vector<4x128xf32>
    %c0_14 = arith.constant 0 : index
    %c0_15 = arith.constant 0 : index
    %60 = vector.load %arg5[%c0_14, %c0_15] : memref<4x128xf32, #tpu.memory_space<vmem>>, vector<4x128xf32>
    tpu.vector_store %arg5[%c0_14, %c0_15], %59 {strides = array<i32>} : memref<4x128xf32, #tpu.memory_space<vmem>>, vector<4x128xf32>,
    return
  }
  func.func @transform_0(%arg0: i32) -> (i32, i32) {
    %c0_i32 = arith.constant 0 : i32
    %c0_i32_0 = arith.constant 0 : i32
    %c0_i32_1 = arith.constant 0 : i32
    return %c0_i32, %c0_i32_0 : i32, i32
  }
  func.func @transform_1(%arg0: i32) -> (i32, i32) {
    %c0_i32 = arith.constant 0 : i32
    %c0_i32_0 = arith.constant 0 : i32
    %c0_i32_1 = arith.constant 0 : i32
    return %c0_i32, %c0_i32_0 : i32, i32
  }
  func.func @transform_2(%arg0: i32) -> (i32, i32) {
    %c0_i32 = arith.constant 0 : i32
    %c0_i32_0 = arith.constant 0 : i32
    %c0_i32_1 = arith.constant 0 : i32
    return %c0_i32, %c0_i32_0 : i32, i32
  }
  func.func @transform_3(%arg0: i32) -> (i32, i32) {
    %c0_i32 = arith.constant 0 : i32
    %c0_i32_0 = arith.constant 0 : i32
    %c0_i32_1 = arith.constant 0 : i32
    return %c0_i32, %c0_i32_0 : i32, i32
  }
  func.func @transform_4(%arg0: i32) -> (i32, i32) {
    %c0_i32 = arith.constant 0 : i32
    %c0_i32_0 = arith.constant 0 : i32
    %c0_i32_1 = arith.constant 0 : i32
    return %c0_i32, %c0_i32_0 : i32, i32
  }
}

</mosaic_0001>

<bundles_post_ra>
// kernel: attention_forward.1
= control target key start
LH: loop header
LB: loop body
LE: loop exit
PB: predicated region body
PF: predicated region fallthrough
CT: control target
= control target key end

     0   :  { %vm128_vm0 = vcmask 1043456   ;;  %s401_s1 = inlined_call_operand.vmem [shape: f32[128,128], index: 1, kind: input, shape index: {}]   ;;  %s402_s0 = inlined_call_operand.vmem [shape: f32[12,128], index: 0, kind: input, shape index: {}]   ;;  %s403_s2 = inlined_call_operand.vmem [shape: f32[1,128], index: 2, kind: input, shape index: {}]   ;;  %s404_s3 = inlined_call_operand.vmem [shape: f32[1,128], index: 3, kind: input, shape index: {}]   ;;  %s405_s4 = inlined_call_operand.vmem [shape: f32[4,128], index: 4, kind: output, shape index: {}]  }
   0x1   :  { %v21_v0 = vld [vmem:[%s401_s1] sm:$0xff]  ;;  %v22_v1 = vld [vmem:[%s401_s1 + $0x8] sm:$0xff]  ;;  %v23_v2 = vld [vmem:[%s401_s1 + $0x10] sm:$0xff] }
   0x2   :  { %v254_v3 = vpack.c.bf16 %v22_v1, %v21_v0  ;;  %v24_v4 = vld [vmem:[%s401_s1 + $0x18] sm:$0xff]  ;;  %v25_v6 = vld [vmem:[%s401_s1 + $0x20] sm:$0xff]  ;;  %v26_v7 = vld [vmem:[%s401_s1 + $0x28] sm:$0xff] }
   0x3   :  { %v258_v5 = vpack.c.bf16 %v24_v4, %v23_v2  ;;  %v262_v8 = vpack.c.bf16 %v26_v7, %v25_v6  ;;  %v350_v9 = vld [vmem:[%s402_s0] sm:$0xff]  ;;  %v27_v10 = vld [vmem:[%s401_s1 + $0x30] sm:$0xff]  ;;  %v28_v11 = vld [vmem:[%s401_s1 + $0x38] sm:$0xff] }
   0x4   :  { %255 = vmatprep.subr.bf16.mxu0 %v254_v3  ;;  %251 = vmatprep.mubr.f32.mxu0 %v350_v9  ;;  %v266_v12 = vpack.c.bf16 %v28_v11, %v27_v10  ;;  %v29_v13 = vld [vmem:[%s401_s1 + $0x40] sm:$0xff]  ;;  %v30_v14 = vld [vmem:[%s401_s1 + $0x48] sm:$0xff]  ;;  %v31_v16 = vld [vmem:[%s401_s1 + $0x50] sm:$0xff] }
   0x5   :  { %257 = vmatpush3.bf16.msra.mxu0 %v254_v3  ;;  %v270_v15 = vpack.c.bf16 %v30_v14, %v29_v13  ;;  %v32_v17 = vld [vmem:[%s401_s1 + $0x58] sm:$0xff]  ;;  %v33_v19 = vld [vmem:[%s401_s1 + $0x60] sm:$0xff]  ;;  %v34_v20 = vld [vmem:[%s401_s1 + $0x68] sm:$0xff] }
   0x6   :  { %259 = vmatprep.subr.bf16.mxu0 %v258_v5  ;;  %v274_v18 = vpack.c.bf16 %v32_v17, %v31_v16  ;;  %v278_v21 = vpack.c.bf16 %v34_v20, %v33_v19  ;;  %v35_v22 = vld [vmem:[%s401_s1 + $0x70] sm:$0xff]  ;;  %v36_v23 = vld [vmem:[%s401_s1 + $0x78] sm:$0xff]  ;;  %v386_v25 = vld [vmem:[%s402_s0 + $0x8] sm:$0xf] }
   0x7   :  { %v282_v24 = vpack.c.bf16 %v36_v23, %v35_v22  ;;  %v199_v26 = vld [vmem:[%s403_s2] ss:$0 sm:$0xff] }
   0x8   :  { %v200_v31 = vld [vmem:[%s404_s3] ss:$0 sm:$0xff] }
   0x9   :  { %261 = vmatpush3.bf16.msra.mxu0 %v258_v5 }
   0xa   :  { %263 = vmatprep.subr.bf16.mxu0 %v262_v8 }
   0xd   :  { %265 = vmatpush3.bf16.msra.mxu0 %v262_v8 }
   0xe   :  { %267 = vmatprep.subr.bf16.mxu0 %v266_v12 }
  0x11   :  { %269 = vmatpush3.bf16.msra.mxu0 %v266_v12 }
  0x12   :  { %271 = vmatprep.subr.bf16.mxu0 %v270_v15 }
  0x15   :  { %273 = vmatpush3.bf16.msra.mxu0 %v270_v15 }
  0x16   :  { %275 = vmatprep.subr.bf16.mxu0 %v274_v18 }
  0x19   :  { %277 = vmatpush3.bf16.msra.mxu0 %v274_v18 }
  0x1a   :  { %279 = vmatprep.subr.bf16.mxu0 %v278_v21 }
  0x1d   :  { %281 = vmatpush3.bf16.msra.mxu0 %v278_v21 }
  0x1e   :  { %283 = vmatprep.subr.bf16.mxu0 %v282_v24 }
  0x21   :  { %285 = vmatpush3.bf16.msra.mxu0 %v282_v24 }
  0x24   :  { %252 = vmatmul.mubr.f32.vlgmr.msra.gmra.mrb[0].mxu0 %v386_v25 }
  0xf7   :  { %v253_v27 = vpop.f32.mrb[0].mxu0 }
  0xf8   :  { %v115_v28 = vadd.f32 %v253_v27, %v199_v26  ;;  %v109_v29 = vpop.f32.mrb[1].mxu0 }
  0xf9   :  { %v110_v30 = vadd.f32 %v199_v26, %v109_v29 }
  0xfa   :  { %292 = vtanh.f32 %v115_v28 }
  0xfb   :  { %294 = vtanh.f32 %v110_v30 }
 0x104   :  { %v293_v32 = vpop.eup %292 }
 0x105   :  { %v295_v33 = vpop.eup %294  ;;  %v127_v34 = vmul.f32 %v293_v32, %v200_v31 }
 0x106   :  { %v126_v35 = vmul.f32 %v295_v33, %v200_v31 }
 0x107   :  { %v154_v36 = vsel %vm128_vm0, %v127_v34, 0.0 }
 0x108   :  { %155 = vadd.xlane.f32.xlu1 %v154_v36  ;;  %v129_v37 = vsel %vm128_vm0, %v126_v35, 0.0  ;;  %v141_v38 = vrot.slane %v126_v35, 4 }
 0x109   :  { %130 = vadd.xlane.f32.xlu0 %v129_v37 }
 0x10a   :  { %v143_v39 = vsel %vm128_vm0, %v141_v38, 0.0 }
 0x10d   :  { %144 = vadd.xlane.f32.xlu0 %v143_v39 }
 0x195   :  { %v156_v40 = vpop.xlane.xlu1 %155 }
 0x196   :  { %v157_v41 = vrot.slane %v156_v40, 4  ;;  %v131_v42 = vpop.xlane.xlu0 %130 }
 0x197   :  { %v132_v43 = vrot.slane %v131_v42, 4 }
 0x198   :  { %v158_v44 = vadd.f32 %v157_v41, %v156_v40 }
 0x199   :  { %v133_v45 = vadd.f32 %v132_v43, %v131_v42 }
 0x19a   :  { %v159_v46 = vrot.slane %v158_v44, 2  ;;  %v145_v47 = vpop.xlane.xlu0 %144 }
 0x19b   :  { %v134_v48 = vrot.slane %v133_v45, 2  ;;  %v146_v49 = vrot.slane %v145_v47, 4 }
 0x19c   :  { %v160_v52 = vadd.f32 %v159_v46, %v158_v44 }
 0x19d   :  { %v147_v50 = vadd.f32 %v146_v49, %v145_v47  ;;  %v135_v51 = vadd.f32 %v134_v48, %v133_v45 }
 0x19e   :  { %v161_v57 = vrot.slane %v160_v52, 1 }
 0x19f   :  { %v148_v53 = vrot.slane %v147_v50, 2  ;;  %v136_v54 = vrot.slane %v135_v51, 1 }
 0x1a0   :  { %v162_v60 = vadd.f32 %v161_v57, %v160_v52 }
 0x1a1   :  { %v149_v55 = vadd.f32 %v148_v53, %v147_v50  ;;  %v137_v56 = vadd.f32 %v136_v54, %v135_v51 }
 0x1a3   :  { %286 = vpush %v137_v56  ;;  %v150_v58 = vrot.slane %v149_v55, 1 }
 0x1a5   :  { %v151_v59 = vadd.f32 %v150_v58, %v149_v55 }
 0x1a7   :  { %288 = vpush %v151_v59 }
 0x1a8   :  { %290 = vpush %v162_v60 }
 0x1d4   :  { %s287_s0 = spop %286 }
 0x1d5   :  { %v139_v61 = vstv %s287_s0 }
 0x1d6   :  { %v165_v63 = vmul.f32 0.0625, %v139_v61 }
 0x1d8   :  { %s289_s2 = spop %288 }
 0x1d9   :  { %v153_v62 = vstv %s289_s2  ;;  %s291_s3 = spop %290 }
 0x1da   :  { %v166_v0 = vmul.f32 0.0625, %v153_v62  ;;  %v164_v1 = vstv %s291_s3 }
 0x1db   :  { %v167_v3 = vmul.f32 0.0625, %v164_v1 }
 0x1dc   :  { %v168_v2 = vmax.f32 %v165_v63, %v166_v0 }
 0x1de   :  { %v169_v4 = vmax.f32 %v168_v2, %v167_v3 }
 0x1e0   :  { %v170_v5 = vsub.f32 %v165_v63, %v169_v4  ;;  %v173_v6 = vsub.f32 %v166_v0, %v169_v4  ;;  %v176_v7 = vsub.f32 %v167_v3, %v169_v4 }
 0x1e2   :  { %v171_v8 = vmul.f32 1.442695, %v170_v5  ;;  %v174_v10 = vmul.f32 1.442695, %v173_v6  ;;  %v177_v11 = vmul.f32 1.442695, %v176_v7 }
 0x1e4   :  { %296 = vpow2.f32 %v171_v8 }
 0x1e5   :  { %298 = vpow2.f32 %v174_v10 }
 0x1e6   :  { %300 = vpow2.f32 %v177_v11 }
 0x1ee   :  { %v297_v12 = vpop.eup %296 }
 0x1ef   :  { %v299_v13 = vpop.eup %298 }
 0x1f0   :  { %v179_v14 = vadd.f32 %v299_v13, %v297_v12  ;;  %v301_v15 = vpop.eup %300 }
 0x1f2   :  { %v180_v16 = vadd.f32 %v301_v15, %v179_v14 }
 0x1f4   :  { %302 = vrcp.f32 %v180_v16 }
 0x1fe   :  { %v303_v17 = vpop.eup %302 }
 0x1ff   :  { %v183_v18 = vmul.f32 %v303_v17, %v297_v12  ;;  %v185_v19 = vmul.f32 %v303_v17, %v299_v13  ;;  %v191_v21 = vmul.f32 %v303_v17, %v301_v15 }
 0x201   :  { %v186_v20 = vmul.f32 %v185_v19, %v350_v9  ;;  %v184_v22 = vmul.f32 %v183_v18, %v350_v9  ;;  %v192_v26 = vmul.f32 %v191_v21, %v386_v25 }
 0x203   :  { %v188_v23 = vrot.slane %v186_v20, 4 }
 0x205   :  { %v190_v24 = vadd.f32 %v188_v23, %v184_v22 }
 0x207   :  { %v193_v27 = vadd.f32 %v192_v26, %v190_v24 }
 0x209   :  { %194 = vst [vmem:[%s405_s4] sm:$0xf] %v193_v27 }

</bundles_post_ra>
